<compile_context>
chip_gen: v6e
topology: v6e:2x2x1
jax: 0.10.0
libtpu: 0.0.40
codegen_flags: <defaults>
</compile_context>

<pallas_src>
import jax
import jax.numpy as jnp
from jax import lax
from jax.experimental import pallas as pl
from jax.experimental.pallas import tpu as pltpu


def _round_up(x, m):
    return ((x + m - 1) // m) * m


def _linear_kernel(x_ref, w_ref, b_ref, o_ref):
    # x_ref: [tm, H]   w_ref: [E_pad, H]   b_ref: [1, E_pad]   o_ref: [tm, E_pad]
    acc = lax.dot_general(
        x_ref[...],
        w_ref[...],
        dimension_numbers=(((1,), (1,)), ((), ())),  # contract over H (no transpose)
        preferred_element_type=jnp.float32,
    )
    # Bias add / epilogue in f32, single cast on store.
    o_ref[...] = (acc + b_ref[...].astype(jnp.float32)).astype(o_ref.dtype)


def itm_head_forward(x, weight, bias, *, tm=512, compute_dtype=None):
    """Forward of ITMHead: x @ weight.T + bias.

    x:      [..., H]
    weight: [E, H]   (PyTorch nn.Linear layout)
    bias:   [E]
    """
    orig_shape = x.shape
    H = orig_shape[-1]
    E = weight.shape[0]
    out_dtype = x.dtype

    x2d = x.reshape(-1, H)
    M = x2d.shape[0]

    # Lane-dense output: pad E up to a multiple of 128 (E=2 -> 128).
    E_pad = _round_up(E, 128)

    # Row tile: multiple of 8, capped by (padded) M and by a VMEM budget that
    # fits the default scoped-VMEM limit of every TPU generation.
    tm = max(8, min(_round_up(tm, 8), _round_up(M, 8)))
    bytes_el = 2 if compute_dtype == jnp.bfloat16 else 4
    per_row = 2 * H * bytes_el + 2 * E_pad * 4          # dbl-buffered x row + out row
    resident = 2 * E_pad * H * bytes_el + 2 * E_pad * 4  # weight + bias buffers
    budget = 24 * 1024 * 1024
    while tm > 8 and tm * per_row + resident > budget:
        tm = max(8, _round_up(tm // 2, 8))

    M_pad = _round_up(M, tm)

    # Zero-pad operands (weight/bias pads are tiny; x pad is < one tile).
    if compute_dtype is not None:
        x2d = x2d.astype(compute_dtype)
        weight = weight.astype(compute_dtype)
    xp = jnp.pad(x2d, ((0, M_pad - M), (0, 0)))
    wp = jnp.pad(weight, ((0, E_pad - E), (0, 0)))                      # [E_pad, H]
    bp = jnp.pad(bias.astype(jnp.float32), (0, E_pad - E)).reshape(1, E_pad)

    grid = (pl.cdiv(M_pad, tm),)

    out = pl.pallas_call(
        _linear_kernel,
        out_shape=jax.ShapeDtypeStruct((M_pad, E_pad), out_dtype),
        grid_spec=pltpu.PrefetchScalarGridSpec(
            num_scalar_prefetch=0,
            grid=grid,
            in_specs=[
                pl.BlockSpec((tm, H), lambda i: (i, 0)),
                # Constant block index across the grid -> fetched once and kept
                # resident (no re-DMA per step).  For very large H this spec
                # could additionally be single-buffered to halve its VMEM use.
                pl.BlockSpec((E_pad, H), lambda i: (0, 0)),
                pl.BlockSpec((1, E_pad), lambda i: (0, 0)),
            ],
            out_specs=pl.BlockSpec((tm, E_pad), lambda i: (i, 0)),
        ),
        compiler_params=pltpu.CompilerParams(
            dimension_semantics=("parallel",),
        ),
    )(xp, wp, bp)

    # TODO(synk): in production this 2-logit head should be fused as an epilogue
    # of the producer (pooler/projection) kernel instead of a standalone call.
    return out[:M, :E].reshape(*orig_shape[:-1], E)


if __name__ == "__main__":
    # Small shapes consistent with the module: batch=2, seq=8, hidden=32, 2 logits.
    batch, seq, hidden = 2, 8, 32
    num_classes = 2

    key = jax.random.PRNGKey(0)
    kx, kw, kb = jax.random.split(key, 3)

    x = jax.random.normal(kx, (batch, seq, hidden), dtype=jnp.float32)
    # Deterministic parameter init (mimics nn.Linear's uniform(-1/sqrt(H), 1/sqrt(H))).
    bound = 1.0 / (hidden ** 0.5)
    weight = jax.random.uniform(kw, (num_classes, hidden), jnp.float32, -bound, bound)
    bias = jax.random.uniform(kb, (num_classes,), jnp.float32, -bound, bound)

    y = itm_head_forward(x, weight, bias)
    jax.block_until_ready(y)

    # Correctness check against plain JAX reference of nn.Linear.
    y_ref = x @ weight.T + bias
    assert y.shape == (batch, seq, num_classes)
    assert jnp.allclose(y, y_ref, atol=1e-5, rtol=1e-5)

    print("KERNEL_OK")
</pallas_src>

<mosaic_0001>
module attributes {stable_mosaic.version = 11 : i64} {
  func.func @_linear_kernel(%arg0: i32, %arg1: memref<16x32xf32, #tpu.memory_space<vmem>>, %arg2: memref<128x32xf32, #tpu.memory_space<vmem>>, %arg3: memref<1x128xf32, #tpu.memory_space<vmem>>, %arg4: memref<16x128xf32, #tpu.memory_space<vmem>>) attributes {dimension_semantics = [#tpu.dimension_semantics<parallel>], iteration_bounds = array<i64: 1>, scalar_prefetch = 0 : i64, scratch_operands = 0 : i64, tpu.core_type = #tpu.core_type<tc>, window_params = [{transform_indices = @transform_0, window_bounds = array<i64: 16, 32>}, {pipeline_mode = #tpu.pipeline_mode<synchronous>, transform_indices = @transform_1, window_bounds = array<i64: 128, 32>}, {pipeline_mode = #tpu.pipeline_mode<synchronous>, transform_indices = @transform_2, window_bounds = array<i64: 1, 128>}, {transform_indices = @transform_3, window_bounds = array<i64: 16, 128>}]} {
    %c0 = arith.constant 0 : index
    %c0_0 = arith.constant 0 : index
    %0 = vector.load %arg1[%c0, %c0_0] : memref<16x32xf32, #tpu.memory_space<vmem>>, vector<16x32xf32>
    %c0_1 = arith.constant 0 : index
    %c0_2 = arith.constant 0 : index
    %1 = vector.load %arg2[%c0_1, %c0_2] : memref<128x32xf32, #tpu.memory_space<vmem>>, vector<128x32xf32>
    %cst = arith.constant dense<0.000000e+00> : vector<16x128xf32>
    %2 = tpu.matmul %0, %1, %cst {dimension_numbers = #tpu.dot_dimension_numbers<[1], [1], [0], [0], [0, 0, 1, 0], [], []>} : vector<16x32xf32>, vector<128x32xf32>, vector<16x128xf32> -> vector<16x128xf32>
    %c0_3 = arith.constant 0 : index
    %c0_4 = arith.constant 0 : index
    %3 = vector.load %arg3[%c0_3, %c0_4] : memref<1x128xf32, #tpu.memory_space<vmem>>, vector<1x128xf32>
    %4 = vector.broadcast %3 : vector<1x128xf32> to vector<16x128xf32>
    %5 = arith.addf %2, %4 : vector<16x128xf32>
    %c0_5 = arith.constant 0 : index
    %c0_6 = arith.constant 0 : index
    %6 = vector.load %arg4[%c0_5, %c0_6] : memref<16x128xf32, #tpu.memory_space<vmem>>, vector<16x128xf32>
    tpu.vector_store %arg4[%c0_5, %c0_6], %5 {strides = array<i32>} : memref<16x128xf32, #tpu.memory_space<vmem>>, vector<16x128xf32>,
    return
  }
  func.func @transform_0(%arg0: i32) -> (i32, i32) {
    %c0_i32 = arith.constant 0 : i32
    %c0_i32_0 = arith.constant 0 : i32
    return %arg0, %c0_i32 : i32, i32
  }
  func.func @transform_1(%arg0: i32) -> (i32, i32) {
    %c0_i32 = arith.constant 0 : i32
    %c0_i32_0 = arith.constant 0 : i32
    %c0_i32_1 = arith.constant 0 : i32
    return %c0_i32, %c0_i32_0 : i32, i32
  }
  func.func @transform_2(%arg0: i32) -> (i32, i32) {
    %c0_i32 = arith.constant 0 : i32
    %c0_i32_0 = arith.constant 0 : i32
    %c0_i32_1 = arith.constant 0 : i32
    return %c0_i32, %c0_i32_0 : i32, i32
  }
  func.func @transform_3(%arg0: i32) -> (i32, i32) {
    %c0_i32 = arith.constant 0 : i32
    %c0_i32_0 = arith.constant 0 : i32
    return %arg0, %c0_i32 : i32, i32
  }
}

</mosaic_0001>

<bundles_post_ra>
// kernel: tpu_custom_call.1
= control target key start
LH: loop header
LB: loop body
LE: loop exit
PB: predicated region body
PF: predicated region fallthrough
CT: control target
= control target key end

     0   :  { %vm40_vm0 = vcmask 261120   ;;  %s402_s0 = inlined_call_operand.vmem [shape: f32[16,32], index: 0, kind: input, shape index: {}]   ;;  %s403_s1 = inlined_call_operand.vmem [shape: f32[128,32], index: 1, kind: input, shape index: {}]   ;;  %s404_s2 = inlined_call_operand.vmem [shape: f32[1,128], index: 2, kind: input, shape index: {}]   ;;  %s405_s3 = inlined_call_operand.hbm [shape: f32[16,128], index: 3, kind: output, shape index: {}]  }
   0x1   :  { %v32_v0 = vld [vmem:[%s403_s1 + $0x78] sm:$0xff]  ;;  %v31_v1 = vld [vmem:[%s403_s1 + $0x70] sm:$0xff]  ;;  %v30_v2 = vld [vmem:[%s403_s1 + $0x68] sm:$0xff] }
   0x2   :  { %225 = vmatprep.subr.msk.mxu0 %vm40_vm0, %v32_v0  ;;  %v15_v3 = vld [vmem:[%s402_s0] sm:$0xff] }
   0x3   :  { %226 = vmatpush3.xpose.msk.msra.mxu0 %vm40_vm0, %v32_v0  ;;  %257 = vmatprep.mubr.msk.f32.mxu0 %vm40_vm0, %v15_v3 }
   0x4   :  { %227 = vmatprep.subr.msk.mxu0 %vm40_vm0, %v31_v1 }
   0x7   :  { %228 = vmatpush3.xpose.msk.msra.mxu0 %vm40_vm0, %v31_v1 }
   0x8   :  { %8 = vsyncpa [#allocation3], 0  ;;  %229 = vmatprep.subr.msk.mxu0 %vm40_vm0, %v30_v2  ;;  %v29_v4 = vld [vmem:[%s403_s1 + $0x60] sm:$0xff]  ;;  %v28_v5 = vld [vmem:[%s403_s1 + $0x58] sm:$0xff]  ;;  %s285_s23 = smov [#allocation2]  }
   0x9   :  { %v27_v6 = vld [vmem:[%s403_s1 + $0x50] sm:$0xff]  ;;  %v26_v7 = vld [vmem:[%s403_s1 + $0x48] sm:$0xff]  ;;  %v25_v8 = vld [vmem:[%s403_s1 + $0x40] sm:$0xff]  ;;  %s177_s24 = sshll.u32 %s285_s23, 4  ;;  %s178_s24 = int_to_ptr.vmem [resolvable:$true] %s177_s24 }
   0xa   :  { %v24_v9 = vld [vmem:[%s403_s1 + $0x38] sm:$0xff]  ;;  %v23_v10 = vld [vmem:[%s403_s1 + $0x30] sm:$0xff]  ;;  %v22_v11 = vld [vmem:[%s403_s1 + $0x28] sm:$0xff]  ;;  %p268_p1 = scmp.lt.s32.totalorder %s178_s24, %s178_s24 }
   0xb   :  { %230 = vmatpush3.xpose.msk.msra.mxu0 %vm40_vm0, %v30_v2  ;;  %v21_v12 = vld [vmem:[%s403_s1 + $0x20] sm:$0xff]  ;;  %v20_v13 = vld [vmem:[%s403_s1 + $0x18] sm:$0xff]  ;;  %v19_v14 = vld [vmem:[%s403_s1 + $0x10] sm:$0xff] }
   0xc   :  { %231 = vmatprep.subr.msk.mxu0 %vm40_vm0, %v29_v4  ;;  %v18_v15 = vld [vmem:[%s403_s1 + $0x8] sm:$0xff]  ;;  %v17_v16 = vld [vmem:[%s403_s1] sm:$0xff]  ;;  %s263_s1 = scalar_lea.vmem %s178_s24, 256 }
   0xd   :  { %v16_v17 = vld [vmem:[%s402_s0 + $0x8] sm:$0xff]  ;;  %v188_v18 = vld [vmem:[%s404_s2] ss:$0 sm:$0xff]  ;;  %p264_p0 = scmp.ne.s32.totalorder %s178_s24, %s263_s1  ;;  %p269_p2 = scmp.lt.s32.totalorder %s263_s1, %s263_s1 }
   0xf   :  { %232 = vmatpush3.xpose.msk.msra.mxu0 %vm40_vm0, %v29_v4  ;;  %p270_p3 = por %p269_p2, %p268_p1 }
  0x10   :  { %233 = vmatprep.subr.msk.mxu0 %vm40_vm0, %v28_v5 }
  0x11   :  { %p271_p4 = pnand %p270_p3, %p264_p0 }
  0x13   :  { %234 = vmatpush3.xpose.msk.msra.mxu0 %vm40_vm0, %v28_v5 }
  0x14   :  { %235 = vmatprep.subr.msk.mxu0 %vm40_vm0, %v27_v6 }
  0x17   :  { %236 = vmatpush3.xpose.msk.msra.mxu0 %vm40_vm0, %v27_v6 }
  0x18   :  { %237 = vmatprep.subr.msk.mxu0 %vm40_vm0, %v26_v7 }
  0x1b   :  { %238 = vmatpush3.xpose.msk.msra.mxu0 %vm40_vm0, %v26_v7 }
  0x1c   :  { %239 = vmatprep.subr.msk.mxu0 %vm40_vm0, %v25_v8 }
  0x1f   :  { %240 = vmatpush3.xpose.msk.msra.mxu0 %vm40_vm0, %v25_v8 }
  0x20   :  { %241 = vmatprep.subr.msk.mxu0 %vm40_vm0, %v24_v9 }
  0x23   :  { %242 = vmatpush3.xpose.msk.msra.mxu0 %vm40_vm0, %v24_v9 }
  0x24   :  { %243 = vmatprep.subr.msk.mxu0 %vm40_vm0, %v23_v10 }
  0x27   :  { %244 = vmatpush3.xpose.msk.msra.mxu0 %vm40_vm0, %v23_v10 }
  0x28   :  { %245 = vmatprep.subr.msk.mxu0 %vm40_vm0, %v22_v11 }
  0x2b   :  { %246 = vmatpush3.xpose.msk.msra.mxu0 %vm40_vm0, %v22_v11 }
  0x2c   :  { %247 = vmatprep.subr.msk.mxu0 %vm40_vm0, %v21_v12 }
  0x2f   :  { %248 = vmatpush3.xpose.msk.msra.mxu0 %vm40_vm0, %v21_v12 }
  0x30   :  { %249 = vmatprep.subr.msk.mxu0 %vm40_vm0, %v20_v13 }
  0x33   :  { %250 = vmatpush3.xpose.msk.msra.mxu0 %vm40_vm0, %v20_v13 }
  0x34   :  { %251 = vmatprep.subr.msk.mxu0 %vm40_vm0, %v19_v14 }
  0x37   :  { %252 = vmatpush3.xpose.msk.msra.mxu0 %vm40_vm0, %v19_v14 }
  0x38   :  { %253 = vmatprep.subr.msk.mxu0 %vm40_vm0, %v18_v15 }
  0x3b   :  { %254 = vmatpush3.xpose.msk.msra.mxu0 %vm40_vm0, %v18_v15 }
  0x3c   :  { %255 = vmatprep.subr.msk.mxu0 %vm40_vm0, %v17_v16 }
  0x3f   :  { %256 = vmatpush3.xpose.msk.msra.mxu0 %vm40_vm0, %v17_v16 }
  0x42   :  { %258 = vmatmul.mubr.msk.f32.vlgmr.msra.gmra.mxu0 %vm40_vm0, %v16_v17 }
 0x102   :  { %v259_v19 = vpop.f32.mrf.mxu0 }
 0x103   :  { %v167_v20 = vadd.f32 %v259_v19, %v188_v18 }
 0x104   :  { %v161_v21 = vpop.f32.mrf.mxu0 }
 0x105   :  { %171 = vst [vmem:[#allocation2 + $0x8] sm:$0xff] %v167_v20  ;;  %v162_v22 = vadd.f32 %v188_v18, %v161_v21 }
 0x107   :  { %170 = vst [vmem:[#allocation2] sm:$0xff] %v162_v22 }
 0x108   :  { %274 = shalt.err (!%p271_p4)
}
 0x109   :  { %s286_s0 = smov 128   ;;  %s287_s25 = smov 8  }
 0x10a   :  { %183 = dma.vmem_to_hbm [thread:$0]  %s178_s24, 256, %s405_s3, [#allocation3], %s286_s0, %s286_s0, %s287_s25  }
 0x10b   :  { %283 = dma.done.wait [#allocation3], 256  }
 0x10c   :  { %284 = vsyncadd [#allocation3], 4294967040 }
 0x10d   :  { %187 = vsyncpa [#allocation3], 1 }

</bundles_post_ra>
